<compile_context>
chip_gen: v7x
topology: tpu7x:2x2x1
jax: 0.10.0
libtpu: 0.0.40
codegen_flags: <defaults>
</compile_context>

<pallas_src>
import functools

import jax
import jax.numpy as jnp
from jax.experimental import pallas as pl
from jax.experimental.pallas import tpu as pltpu


def _round_up(x, m):
    return ((x + m - 1) // m) * m


# ---------------------------------------------------------------------------
# Kernel: whole forward pass for one batch tile.
#   h = relu(x @ W_in' + t_in')                       # BN already folded
#   repeat num_hidden times (fully unrolled):
#       h = relu(h @ W_h'[i] + t_h'[i]) + h           # residual
#   out = h @ W_out_pad + b_out_pad                   # lane-padded output
# Matmuls: bf16 x bf16 -> f32 accumulate on the MXU.
# ---------------------------------------------------------------------------
def _net_kernel(num_hidden, *refs):
    if num_hidden > 0:
        (x_ref, w_in_ref, t_in_ref,
         w_h_ref, t_h_ref,
         w_out_ref, b_out_ref, o_ref) = refs
    else:
        (x_ref, w_in_ref, t_in_ref,
         w_out_ref, b_out_ref, o_ref) = refs
        w_h_ref = t_h_ref = None

    # input layer (+ folded BN) + relu.  Eval-mode nn.Dropout == identity.
    x = x_ref[...].astype(jnp.bfloat16)
    h = jnp.dot(x, w_in_ref[...], preferred_element_type=jnp.float32)
    h = jnp.maximum(h + t_in_ref[...], 0.0)

    if num_hidden > 0:
        # Load the whole shift table once; it lives in a couple of vregs.
        t_h = t_h_ref[...]                               # (num_hidden, H) f32
        # Fully unrolled -> one basic block; scheduler overlaps next layer's
        # weight push with the current relu/residual epilogue.
        for i in range(num_hidden):
            y = jnp.dot(h.astype(jnp.bfloat16), w_h_ref[i],
                        preferred_element_type=jnp.float32)
            y = jnp.maximum(y + t_h[i], 0.0)
            h = y + h                                    # residual add (f32)

    # output layer (lane-padded, unmasked full-width store)
    o_ref[...] = (jnp.dot(h.astype(jnp.bfloat16), w_out_ref[...],
                          preferred_element_type=jnp.float32)
                  + b_out_ref[...])


def net_forward(x, params, *, block_m=128):
    """Run the Pallas kernel. x: [B, input_size] f32. Returns [B, output_size] f32."""
    batch, in_size = x.shape
    out_pad = params["w_out"].shape[1]          # lane-padded width (mult of 128)
    out_size = params["out_size"]
    num_hidden = params["w_h"].shape[0]

    # Batch tiling: big batches use block_m-row tiles; small batches use one
    # tile rounded up to a multiple of 8 (sublane alignment).
    bm = block_m if batch >= block_m else _round_up(batch, 8)
    b_pad = _round_up(batch, bm)
    if b_pad != batch:
        x = jnp.pad(x, ((0, b_pad - batch), (0, 0)))
    grid = (b_pad // bm,)

    # Constant index_map -> weights stay VMEM-resident across grid steps.
    def const_spec(a):
        nd = a.ndim
        return pl.BlockSpec(a.shape, lambda i, _nd=nd: (0,) * _nd)

    x_spec = pl.BlockSpec((bm, in_size), lambda i: (i, 0))
    out_spec = pl.BlockSpec((bm, out_pad), lambda i: (i, 0))

    if num_hidden > 0:
        weights = (params["w_in"], params["t_in"],
                   params["w_h"], params["t_h"],
                   params["w_out"], params["b_out"])
    else:
        weights = (params["w_in"], params["t_in"],
                   params["w_out"], params["b_out"])

    out = pl.pallas_call(
        functools.partial(_net_kernel, num_hidden),
        out_shape=jax.ShapeDtypeStruct((b_pad, out_pad), jnp.float32),
        grid=grid,
        in_specs=[x_spec] + [const_spec(w) for w in weights],
        out_specs=out_spec,
        compiler_params=pltpu.CompilerParams(
            dimension_semantics=("parallel",)),   # shard batch tiles across TCs (v7x)
    )(x, *weights)
    return out[:batch, :out_size]


# ---------------------------------------------------------------------------
# Parameter construction (glue, plain JAX)
# ---------------------------------------------------------------------------
def make_raw_params(key, input_size, hidden_size, output_size, num_layers):
    """Raw f32 parameters mirroring the PyTorch module (Linear + eval-mode BN)."""
    num_hidden = num_layers - 1
    eps = 1e-5
    ks = list(jax.random.split(key, 16))

    def fold_bn(gamma, beta, mean, var):
        scale = gamma / jnp.sqrt(var + eps)
        shift = beta - mean * scale
        return scale, shift

    # input Linear, stored as [in, out] (== PyTorch W.T)
    w_in = jax.random.normal(ks[0], (input_size, hidden_size), jnp.float32) * 0.1
    b_in = jax.random.normal(ks[1], (1, hidden_size), jnp.float32) * 0.1
    g_in = 1.0 + 0.1 * jax.random.normal(ks[2], (1, hidden_size), jnp.float32)
    be_in = 0.1 * jax.random.normal(ks[3], (1, hidden_size), jnp.float32)
    mu_in = 0.1 * jax.random.normal(ks[4], (1, hidden_size), jnp.float32)
    var_in = 1.0 + 0.1 * jax.random.uniform(ks[5], (1, hidden_size), jnp.float32)
    s_in, t_in = fold_bn(g_in, be_in, mu_in, var_in)

    # hidden Linear + BN stacks
    w_h = jax.random.normal(ks[6], (num_hidden, hidden_size, hidden_size),
                            jnp.float32) * 0.1
    b_h = jax.random.normal(ks[7], (num_hidden, 1, hidden_size), jnp.float32) * 0.1
    g_h = 1.0 + 0.1 * jax.random.normal(ks[8], (num_hidden, 1, hidden_size), jnp.float32)
    be_h = 0.1 * jax.random.normal(ks[9], (num_hidden, 1, hidden_size), jnp.float32)
    mu_h = 0.1 * jax.random.normal(ks[10], (num_hidden, 1, hidden_size), jnp.float32)
    var_h = 1.0 + 0.1 * jax.random.uniform(ks[11], (num_hidden, 1, hidden_size),
                                           jnp.float32)
    s_h, t_h = fold_bn(g_h, be_h, mu_h, var_h)

    # output Linear
    w_out = jax.random.normal(ks[12], (hidden_size, output_size), jnp.float32) * 0.1
    b_out = jax.random.normal(ks[13], (1, output_size), jnp.float32) * 0.1

    return dict(w_in=w_in, b_in=b_in, s_in=s_in, t_in=t_in,
                w_h=w_h, b_h=b_h, s_h=s_h, t_h=t_h,
                w_out=w_out, b_out=b_out)


def fold_params(raw, output_size):
    """Fold BN scale into weights, cast MXU operands to bf16, lane-pad the output layer."""
    # (x @ W + b) * s + t  ==  x @ (W * s) + (b * s + t)
    w_in = (raw["w_in"] * raw["s_in"]).astype(jnp.bfloat16)
    t_in = raw["b_in"] * raw["s_in"] + raw["t_in"]                   # (1, H) f32

    num_hidden, hidden_size = raw["w_h"].shape[0], raw["w_h"].shape[1]
    w_h = (raw["w_h"] * raw["s_h"]).astype(jnp.bfloat16)             # column scale
    # 2-D shift table (num_hidden, H) instead of (num_hidden, 1, H): one padded
    # tile in VMEM rather than 11, and a single in-kernel load.
    t_h = (raw["b_h"] * raw["s_h"] + raw["t_h"]).reshape(num_hidden, hidden_size)

    out_pad = _round_up(max(output_size, 1), 128)                     # lane-dense width
    w_out = jnp.zeros((hidden_size, out_pad), jnp.float32)
    w_out = w_out.at[:, :output_size].set(raw["w_out"]).astype(jnp.bfloat16)
    b_out = jnp.zeros((1, out_pad), jnp.float32)
    b_out = b_out.at[:, :output_size].set(raw["b_out"])

    return dict(w_in=w_in, t_in=t_in, w_h=w_h, t_h=t_h,
                w_out=w_out, b_out=b_out, out_size=output_size)


# ---------------------------------------------------------------------------
# Pure-JAX references
# ---------------------------------------------------------------------------
def net_forward_ref_matched(x, p):
    """Same folded/bf16-operand math as the kernel (tight-tolerance check)."""
    h = jnp.dot(x.astype(jnp.bfloat16), p["w_in"],
                preferred_element_type=jnp.float32)
    h = jnp.maximum(h + p["t_in"], 0.0)
    for i in range(p["w_h"].shape[0]):
        y = jnp.dot(h.astype(jnp.bfloat16), p["w_h"][i],
                    preferred_element_type=jnp.float32)
        h = jnp.maximum(y + p["t_h"][i], 0.0) + h
    out = jnp.dot(h.astype(jnp.bfloat16), p["w_out"],
                  preferred_element_type=jnp.float32) + p["b_out"]
    return out[:, :p["out_size"]]


def net_forward_ref_f32(x, raw):
    """Original f32 semantics of the PyTorch module (eval mode, BN unfolded)."""
    h = jnp.maximum((x @ raw["w_in"] + raw["b_in"]) * raw["s_in"] + raw["t_in"], 0.0)
    for i in range(raw["w_h"].shape[0]):
        y = (h @ raw["w_h"][i] + raw["b_h"][i]) * raw["s_h"][i] + raw["t_h"][i]
        h = jnp.maximum(y, 0.0) + h
    return h @ raw["w_out"] + raw["b_out"]


if __name__ == "__main__":
    # small shapes consistent with the module's MLP forward
    batch, input_size, hidden_size, output_size, num_layers = 8, 16, 32, 1, 12

    key = jax.random.PRNGKey(0)
    kx, kx2, kp = jax.random.split(key, 3)
    x = jax.random.normal(kx, (batch, input_size), jnp.float32)

    raw = make_raw_params(kp, input_size, hidden_size, output_size, num_layers)
    params = fold_params(raw, output_size)

    # --- small-batch path (single tile) ---
    out = jax.block_until_ready(net_forward(x, params))
    assert out.shape == (batch, output_size)
    ref_matched = net_forward_ref_matched(x, params)
    assert jnp.allclose(out, ref_matched, rtol=1e-3, atol=2e-3), "mismatch vs matched ref"

    # loose sanity check against full-f32 module semantics (bf16 MXU operands only
    # introduce small rounding differences)
    ref_f32 = net_forward_ref_f32(x, raw)
    max_diff = jnp.max(jnp.abs(out - ref_f32))
    assert max_diff < 0.25 * (1.0 + jnp.max(jnp.abs(ref_f32))), f"f32 drift {max_diff}"

    # --- large-batch path: exercises the batch grid (2 tiles, padded rows) ---
    big_batch = 200
    x_big = jax.random.normal(kx2, (big_batch, input_size), jnp.float32)
    out_big = jax.block_until_ready(net_forward(x_big, params))
    assert out_big.shape == (big_batch, output_size)
    ref_big = net_forward_ref_matched(x_big, params)
    assert jnp.allclose(out_big, ref_big, rtol=1e-3, atol=2e-3), "mismatch on batched grid"

    print("KERNEL_OK")
</pallas_src>

<mosaic_0001>
module attributes {stable_mosaic.version = 11 : i64} {
  func.func @_net_kernel(%arg0: i32, %arg1: memref<8x16xf32, #tpu.memory_space<vmem>>, %arg2: memref<16x32xbf16, #tpu.memory_space<vmem>>, %arg3: memref<1x32xf32, #tpu.memory_space<vmem>>, %arg4: memref<11x32x32xbf16, #tpu.memory_space<vmem>>, %arg5: memref<11x32xf32, #tpu.memory_space<vmem>>, %arg6: memref<32x128xbf16, #tpu.memory_space<vmem>>, %arg7: memref<1x128xf32, #tpu.memory_space<vmem>>, %arg8: memref<8x128xf32, #tpu.memory_space<vmem>>) attributes {dimension_semantics = [#tpu.dimension_semantics<parallel>], iteration_bounds = array<i64: 1>, scalar_prefetch = 0 : i64, scratch_operands = 0 : i64, tpu.core_type = #tpu.core_type<tc>, window_params = [{transform_indices = @transform_0, window_bounds = array<i64: 8, 16>}, {pipeline_mode = #tpu.pipeline_mode<synchronous>, transform_indices = @transform_1, window_bounds = array<i64: 16, 32>}, {pipeline_mode = #tpu.pipeline_mode<synchronous>, transform_indices = @transform_2, window_bounds = array<i64: 1, 32>}, {pipeline_mode = #tpu.pipeline_mode<synchronous>, transform_indices = @transform_3, window_bounds = array<i64: 11, 32, 32>}, {pipeline_mode = #tpu.pipeline_mode<synchronous>, transform_indices = @transform_4, window_bounds = array<i64: 11, 32>}, {pipeline_mode = #tpu.pipeline_mode<synchronous>, transform_indices = @transform_5, window_bounds = array<i64: 32, 128>}, {pipeline_mode = #tpu.pipeline_mode<synchronous>, transform_indices = @transform_6, window_bounds = array<i64: 1, 128>}, {transform_indices = @transform_7, window_bounds = array<i64: 8, 128>}]} {
    %c0 = arith.constant 0 : index
    %c0_0 = arith.constant 0 : index
    %0 = vector.load %arg1[%c0, %c0_0] : memref<8x16xf32, #tpu.memory_space<vmem>>, vector<8x16xf32>
    %1 = arith.truncf %0 : vector<8x16xf32> to vector<8x16xbf16>
    %c0_1 = arith.constant 0 : index
    %c0_2 = arith.constant 0 : index
    %2 = vector.load %arg2[%c0_1, %c0_2] : memref<16x32xbf16, #tpu.memory_space<vmem>>, vector<16x32xbf16>
    %cst = arith.constant dense<0.000000e+00> : vector<8x32xf32>
    %3 = tpu.matmul %1, %2, %cst {dimension_numbers = #tpu.dot_dimension_numbers<[1], [0], [0], [1], [0, 0, 1, 1], [], []>} : vector<8x16xbf16>, vector<16x32xbf16>, vector<8x32xf32> -> vector<8x32xf32>
    %c0_3 = arith.constant 0 : index
    %c0_4 = arith.constant 0 : index
    %4 = vector.load %arg3[%c0_3, %c0_4] : memref<1x32xf32, #tpu.memory_space<vmem>>, vector<1x32xf32>
    %5 = vector.broadcast %4 : vector<1x32xf32> to vector<8x32xf32>
    %6 = arith.addf %3, %5 : vector<8x32xf32>
    %cst_5 = arith.constant 0.000000e+00 : f32
    %7 = vector.broadcast %cst_5 : f32 to vector<8x32xf32>
    %8 = arith.maximumf %6, %7 : vector<8x32xf32>
    %c0_6 = arith.constant 0 : index
    %c0_7 = arith.constant 0 : index
    %9 = vector.load %arg5[%c0_6, %c0_7] : memref<11x32xf32, #tpu.memory_space<vmem>>, vector<11x32xf32>
    %10 = arith.truncf %8 : vector<8x32xf32> to vector<8x32xbf16>
    %c0_8 = arith.constant 0 : index
    %c0_9 = arith.constant 0 : index
    %c0_10 = arith.constant 0 : index
    %11 = vector.load %arg4[%c0_8, %c0_9, %c0_10] : memref<11x32x32xbf16, #tpu.memory_space<vmem>>, vector<1x32x32xbf16>
    %12 = vector.shape_cast %11 : vector<1x32x32xbf16> to vector<32x32xbf16>
    %cst_11 = arith.constant dense<0.000000e+00> : vector<8x32xf32>
    %13 = tpu.matmul %10, %12, %cst_11 {dimension_numbers = #tpu.dot_dimension_numbers<[1], [0], [0], [1], [0, 0, 1, 1], [], []>} : vector<8x32xbf16>, vector<32x32xbf16>, vector<8x32xf32> -> vector<8x32xf32>
    %14 = vector.extract_strided_slice %9 {offsets = [0, 0], sizes = [1, 32], strides = [1, 1]} : vector<11x32xf32> to vector<1x32xf32>
    %15 = vector.shape_cast %14 : vector<1x32xf32> to vector<32xf32>
    %16 = vector.shape_cast %15 : vector<32xf32> to vector<1x32xf32>
    %17 = vector.broadcast %16 : vector<1x32xf32> to vector<8x32xf32>
    %18 = arith.addf %13, %17 : vector<8x32xf32>
    %cst_12 = arith.constant 0.000000e+00 : f32
    %19 = vector.broadcast %cst_12 : f32 to vector<8x32xf32>
    %20 = arith.maximumf %18, %19 : vector<8x32xf32>
    %21 = arith.addf %20, %8 : vector<8x32xf32>
    %22 = arith.truncf %21 : vector<8x32xf32> to vector<8x32xbf16>
    %c1 = arith.constant 1 : index
    %c0_13 = arith.constant 0 : index
    %c0_14 = arith.constant 0 : index
    %23 = vector.load %arg4[%c1, %c0_13, %c0_14] : memref<11x32x32xbf16, #tpu.memory_space<vmem>>, vector<1x32x32xbf16>
    %24 = vector.shape_cast %23 : vector<1x32x32xbf16> to vector<32x32xbf16>
    %cst_15 = arith.constant dense<0.000000e+00> : vector<8x32xf32>
    %25 = tpu.matmul %22, %24, %cst_15 {dimension_numbers = #tpu.dot_dimension_numbers<[1], [0], [0], [1], [0, 0, 1, 1], [], []>} : vector<8x32xbf16>, vector<32x32xbf16>, vector<8x32xf32> -> vector<8x32xf32>
    %26 = vector.extract_strided_slice %9 {offsets = [1, 0], sizes = [1, 32], strides = [1, 1]} : vector<11x32xf32> to vector<1x32xf32>
    %27 = vector.shape_cast %26 : vector<1x32xf32> to vector<32xf32>
    %28 = vector.shape_cast %27 : vector<32xf32> to vector<1x32xf32>
    %29 = vector.broadcast %28 : vector<1x32xf32> to vector<8x32xf32>
    %30 = arith.addf %25, %29 : vector<8x32xf32>
    %cst_16 = arith.constant 0.000000e+00 : f32
    %31 = vector.broadcast %cst_16 : f32 to vector<8x32xf32>
    %32 = arith.maximumf %30, %31 : vector<8x32xf32>
    %33 = arith.addf %32, %21 : vector<8x32xf32>
    %34 = arith.truncf %33 : vector<8x32xf32> to vector<8x32xbf16>
    %c2 = arith.constant 2 : index
    %c0_17 = arith.constant 0 : index
    %c0_18 = arith.constant 0 : index
    %35 = vector.load %arg4[%c2, %c0_17, %c0_18] : memref<11x32x32xbf16, #tpu.memory_space<vmem>>, vector<1x32x32xbf16>
    %36 = vector.shape_cast %35 : vector<1x32x32xbf16> to vector<32x32xbf16>
    %cst_19 = arith.constant dense<0.000000e+00> : vector<8x32xf32>
    %37 = tpu.matmul %34, %36, %cst_19 {dimension_numbers = #tpu.dot_dimension_numbers<[1], [0], [0], [1], [0, 0, 1, 1], [], []>} : vector<8x32xbf16>, vector<32x32xbf16>, vector<8x32xf32> -> vector<8x32xf32>
    %38 = vector.extract_strided_slice %9 {offsets = [2, 0], sizes = [1, 32], strides = [1, 1]} : vector<11x32xf32> to vector<1x32xf32>
    %39 = vector.shape_cast %38 : vector<1x32xf32> to vector<32xf32>
    %40 = vector.shape_cast %39 : vector<32xf32> to vector<1x32xf32>
    %41 = vector.broadcast %40 : vector<1x32xf32> to vector<8x32xf32>
    %42 = arith.addf %37, %41 : vector<8x32xf32>
    %cst_20 = arith.constant 0.000000e+00 : f32
    %43 = vector.broadcast %cst_20 : f32 to vector<8x32xf32>
    %44 = arith.maximumf %42, %43 : vector<8x32xf32>
    %45 = arith.addf %44, %33 : vector<8x32xf32>
    %46 = arith.truncf %45 : vector<8x32xf32> to vector<8x32xbf16>
    %c3 = arith.constant 3 : index
    %c0_21 = arith.constant 0 : index
    %c0_22 = arith.constant 0 : index
    %47 = vector.load %arg4[%c3, %c0_21, %c0_22] : memref<11x32x32xbf16, #tpu.memory_space<vmem>>, vector<1x32x32xbf16>
    %48 = vector.shape_cast %47 : vector<1x32x32xbf16> to vector<32x32xbf16>
    %cst_23 = arith.constant dense<0.000000e+00> : vector<8x32xf32>
    %49 = tpu.matmul %46, %48, %cst_23 {dimension_numbers = #tpu.dot_dimension_numbers<[1], [0], [0], [1], [0, 0, 1, 1], [], []>} : vector<8x32xbf16>, vector<32x32xbf16>, vector<8x32xf32> -> vector<8x32xf32>
    %50 = vector.extract_strided_slice %9 {offsets = [3, 0], sizes = [1, 32], strides = [1, 1]} : vector<11x32xf32> to vector<1x32xf32>
    %51 = vector.shape_cast %50 : vector<1x32xf32> to vector<32xf32>
    %52 = vector.shape_cast %51 : vector<32xf32> to vector<1x32xf32>
    %53 = vector.broadcast %52 : vector<1x32xf32> to vector<8x32xf32>
    %54 = arith.addf %49, %53 : vector<8x32xf32>
    %cst_24 = arith.constant 0.000000e+00 : f32
    %55 = vector.broadcast %cst_24 : f32 to vector<8x32xf32>
    %56 = arith.maximumf %54, %55 : vector<8x32xf32>
    %57 = arith.addf %56, %45 : vector<8x32xf32>
    %58 = arith.truncf %57 : vector<8x32xf32> to vector<8x32xbf16>
    %c4 = arith.constant 4 : index
    %c0_25 = arith.constant 0 : index
    %c0_26 = arith.constant 0 : index
    %59 = vector.load %arg4[%c4, %c0_25, %c0_26] : memref<11x32x32xbf16, #tpu.memory_space<vmem>>, vector<1x32x32xbf16>
    %60 = vector.shape_cast %59 : vector<1x32x32xbf16> to vector<32x32xbf16>
    %cst_27 = arith.constant dense<0.000000e+00> : vector<8x32xf32>
    %61 = tpu.matmul %58, %60, %cst_27 {dimension_numbers = #tpu.dot_dimension_numbers<[1], [0], [0], [1], [0, 0, 1, 1], [], []>} : vector<8x32xbf16>, vector<32x32xbf16>, vector<8x32xf32> -> vector<8x32xf32>
    %62 = vector.extract_strided_slice %9 {offsets = [4, 0], sizes = [1, 32], strides = [1, 1]} : vector<11x32xf32> to vector<1x32xf32>
    %63 = vector.shape_cast %62 : vector<1x32xf32> to vector<32xf32>
    %64 = vector.shape_cast %63 : vector<32xf32> to vector<1x32xf32>
    %65 = vector.broadcast %64 : vector<1x32xf32> to vector<8x32xf32>
    %66 = arith.addf %61, %65 : vector<8x32xf32>
    %cst_28 = arith.constant 0.000000e+00 : f32
    %67 = vector.broadcast %cst_28 : f32 to vector<8x32xf32>
    %68 = arith.maximumf %66, %67 : vector<8x32xf32>
    %69 = arith.addf %68, %57 : vector<8x32xf32>
    %70 = arith.truncf %69 : vector<8x32xf32> to vector<8x32xbf16>
    %c5 = arith.constant 5 : index
    %c0_29 = arith.constant 0 : index
    %c0_30 = arith.constant 0 : index
    %71 = vector.load %arg4[%c5, %c0_29, %c0_30] : memref<11x32x32xbf16, #tpu.memory_space<vmem>>, vector<1x32x32xbf16>
    %72 = vector.shape_cast %71 : vector<1x32x32xbf16> to vector<32x32xbf16>
    %cst_31 = arith.constant dense<0.000000e+00> : vector<8x32xf32>
    %73 = tpu.matmul %70, %72, %cst_31 {dimension_numbers = #tpu.dot_dimension_numbers<[1], [0], [0], [1], [0, 0, 1, 1], [], []>} : vector<8x32xbf16>, vector<32x32xbf16>, vector<8x32xf32> -> vector<8x32xf32>
    %74 = vector.extract_strided_slice %9 {offsets = [5, 0], sizes = [1, 32], strides = [1, 1]} : vector<11x32xf32> to vector<1x32xf32>
    %75 = vector.shape_cast %74 : vector<1x32xf32> to vector<32xf32>
    %76 = vector.shape_cast %75 : vector<32xf32> to vector<1x32xf32>
    %77 = vector.broadcast %76 : vector<1x32xf32> to vector<8x32xf32>
    %78 = arith.addf %73, %77 : vector<8x32xf32>
    %cst_32 = arith.constant 0.000000e+00 : f32
    %79 = vector.broadcast %cst_32 : f32 to vector<8x32xf32>
    %80 = arith.maximumf %78, %79 : vector<8x32xf32>
    %81 = arith.addf %80, %69 : vector<8x32xf32>
    %82 = arith.truncf %81 : vector<8x32xf32> to vector<8x32xbf16>
    %c6 = arith.constant 6 : index
    %c0_33 = arith.constant 0 : index
    %c0_34 = arith.constant 0 : index
    %83 = vector.load %arg4[%c6, %c0_33, %c0_34] : memref<11x32x32xbf16, #tpu.memory_space<vmem>>, vector<1x32x32xbf16>
    %84 = vector.shape_cast %83 : vector<1x32x32xbf16> to vector<32x32xbf16>
    %cst_35 = arith.constant dense<0.000000e+00> : vector<8x32xf32>
    %85 = tpu.matmul %82, %84, %cst_35 {dimension_numbers = #tpu.dot_dimension_numbers<[1], [0], [0], [1], [0, 0, 1, 1], [], []>} : vector<8x32xbf16>, vector<32x32xbf16>, vector<8x32xf32> -> vector<8x32xf32>
    %86 = vector.extract_strided_slice %9 {offsets = [6, 0], sizes = [1, 32], strides = [1, 1]} : vector<11x32xf32> to vector<1x32xf32>
    %87 = vector.shape_cast %86 : vector<1x32xf32> to vector<32xf32>
    %88 = vector.shape_cast %87 : vector<32xf32> to vector<1x32xf32>
    %89 = vector.broadcast %88 : vector<1x32xf32> to vector<8x32xf32>
    %90 = arith.addf %85, %89 : vector<8x32xf32>
    %cst_36 = arith.constant 0.000000e+00 : f32
    %91 = vector.broadcast %cst_36 : f32 to vector<8x32xf32>
    %92 = arith.maximumf %90, %91 : vector<8x32xf32>
    %93 = arith.addf %92, %81 : vector<8x32xf32>
    %94 = arith.truncf %93 : vector<8x32xf32> to vector<8x32xbf16>
    %c7 = arith.constant 7 : index
    %c0_37 = arith.constant 0 : index
    %c0_38 = arith.constant 0 : index
    %95 = vector.load %arg4[%c7, %c0_37, %c0_38] : memref<11x32x32xbf16, #tpu.memory_space<vmem>>, vector<1x32x32xbf16>
    %96 = vector.shape_cast %95 : vector<1x32x32xbf16> to vector<32x32xbf16>
    %cst_39 = arith.constant dense<0.000000e+00> : vector<8x32xf32>
    %97 = tpu.matmul %94, %96, %cst_39 {dimension_numbers = #tpu.dot_dimension_numbers<[1], [0], [0], [1], [0, 0, 1, 1], [], []>} : vector<8x32xbf16>, vector<32x32xbf16>, vector<8x32xf32> -> vector<8x32xf32>
    %98 = vector.extract_strided_slice %9 {offsets = [7, 0], sizes = [1, 32], strides = [1, 1]} : vector<11x32xf32> to vector<1x32xf32>
    %99 = vector.shape_cast %98 : vector<1x32xf32> to vector<32xf32>
    %100 = vector.shape_cast %99 : vector<32xf32> to vector<1x32xf32>
    %101 = vector.broadcast %100 : vector<1x32xf32> to vector<8x32xf32>
    %102 = arith.addf %97, %101 : vector<8x32xf32>
    %cst_40 = arith.constant 0.000000e+00 : f32
    %103 = vector.broadcast %cst_40 : f32 to vector<8x32xf32>
    %104 = arith.maximumf %102, %103 : vector<8x32xf32>
    %105 = arith.addf %104, %93 : vector<8x32xf32>
    %106 = arith.truncf %105 : vector<8x32xf32> to vector<8x32xbf16>
    %c8 = arith.constant 8 : index
    %c0_41 = arith.constant 0 : index
    %c0_42 = arith.constant 0 : index
    %107 = vector.load %arg4[%c8, %c0_41, %c0_42] : memref<11x32x32xbf16, #tpu.memory_space<vmem>>, vector<1x32x32xbf16>
    %108 = vector.shape_cast %107 : vector<1x32x32xbf16> to vector<32x32xbf16>
    %cst_43 = arith.constant dense<0.000000e+00> : vector<8x32xf32>
    %109 = tpu.matmul %106, %108, %cst_43 {dimension_numbers = #tpu.dot_dimension_numbers<[1], [0], [0], [1], [0, 0, 1, 1], [], []>} : vector<8x32xbf16>, vector<32x32xbf16>, vector<8x32xf32> -> vector<8x32xf32>
    %110 = vector.extract_strided_slice %9 {offsets = [8, 0], sizes = [1, 32], strides = [1, 1]} : vector<11x32xf32> to vector<1x32xf32>
    %111 = vector.shape_cast %110 : vector<1x32xf32> to vector<32xf32>
    %112 = vector.shape_cast %111 : vector<32xf32> to vector<1x32xf32>
    %113 = vector.broadcast %112 : vector<1x32xf32> to vector<8x32xf32>
    %114 = arith.addf %109, %113 : vector<8x32xf32>
    %cst_44 = arith.constant 0.000000e+00 : f32
    %115 = vector.broadcast %cst_44 : f32 to vector<8x32xf32>
    %116 = arith.maximumf %114, %115 : vector<8x32xf32>
    %117 = arith.addf %116, %105 : vector<8x32xf32>
    %118 = arith.truncf %117 : vector<8x32xf32> to vector<8x32xbf16>
    %c9 = arith.constant 9 : index
    %c0_45 = arith.constant 0 : index
    %c0_46 = arith.constant 0 : index
    %119 = vector.load %arg4[%c9, %c0_45, %c0_46] : memref<11x32x32xbf16, #tpu.memory_space<vmem>>, vector<1x32x32xbf16>
    %120 = vector.shape_cast %119 : vector<1x32x32xbf16> to vector<32x32xbf16>
    %cst_47 = arith.constant dense<0.000000e+00> : vector<8x32xf32>
    %121 = tpu.matmul %118, %120, %cst_47 {dimension_numbers = #tpu.dot_dimension_numbers<[1], [0], [0], [1], [0, 0, 1, 1], [], []>} : vector<8x32xbf16>, vector<32x32xbf16>, vector<8x32xf32> -> vector<8x32xf32>
    %122 = vector.extract_strided_slice %9 {offsets = [9, 0], sizes = [1, 32], strides = [1, 1]} : vector<11x32xf32> to vector<1x32xf32>
    %123 = vector.shape_cast %122 : vector<1x32xf32> to vector<32xf32>
    %124 = vector.shape_cast %123 : vector<32xf32> to vector<1x32xf32>
    %125 = vector.broadcast %124 : vector<1x32xf32> to vector<8x32xf32>
    %126 = arith.addf %121, %125 : vector<8x32xf32>
    %cst_48 = arith.constant 0.000000e+00 : f32
    %127 = vector.broadcast %cst_48 : f32 to vector<8x32xf32>
    %128 = arith.maximumf %126, %127 : vector<8x32xf32>
    %129 = arith.addf %128, %117 : vector<8x32xf32>
    %130 = arith.truncf %129 : vector<8x32xf32> to vector<8x32xbf16>
    %c10 = arith.constant 10 : index
    %c0_49 = arith.constant 0 : index
    %c0_50 = arith.constant 0 : index
    %131 = vector.load %arg4[%c10, %c0_49, %c0_50] : memref<11x32x32xbf16, #tpu.memory_space<vmem>>, vector<1x32x32xbf16>
    %132 = vector.shape_cast %131 : vector<1x32x32xbf16> to vector<32x32xbf16>
    %cst_51 = arith.constant dense<0.000000e+00> : vector<8x32xf32>
    %133 = tpu.matmul %130, %132, %cst_51 {dimension_numbers = #tpu.dot_dimension_numbers<[1], [0], [0], [1], [0, 0, 1, 1], [], []>} : vector<8x32xbf16>, vector<32x32xbf16>, vector<8x32xf32> -> vector<8x32xf32>
    %134 = vector.extract_strided_slice %9 {offsets = [10, 0], sizes = [1, 32], strides = [1, 1]} : vector<11x32xf32> to vector<1x32xf32>
    %135 = vector.shape_cast %134 : vector<1x32xf32> to vector<32xf32>
    %136 = vector.shape_cast %135 : vector<32xf32> to vector<1x32xf32>
    %137 = vector.broadcast %136 : vector<1x32xf32> to vector<8x32xf32>
    %138 = arith.addf %133, %137 : vector<8x32xf32>
    %cst_52 = arith.constant 0.000000e+00 : f32
    %139 = vector.broadcast %cst_52 : f32 to vector<8x32xf32>
    %140 = arith.maximumf %138, %139 : vector<8x32xf32>
    %141 = arith.addf %140, %129 : vector<8x32xf32>
    %142 = arith.truncf %141 : vector<8x32xf32> to vector<8x32xbf16>
    %c0_53 = arith.constant 0 : index
    %c0_54 = arith.constant 0 : index
    %143 = vector.load %arg6[%c0_53, %c0_54] : memref<32x128xbf16, #tpu.memory_space<vmem>>, vector<32x128xbf16>
    %cst_55 = arith.constant dense<0.000000e+00> : vector<8x128xf32>
    %144 = tpu.matmul %142, %143, %cst_55 {dimension_numbers = #tpu.dot_dimension_numbers<[1], [0], [0], [1], [0, 0, 1, 1], [], []>} : vector<8x32xbf16>, vector<32x128xbf16>, vector<8x128xf32> -> vector<8x128xf32>
    %c0_56 = arith.constant 0 : index
    %c0_57 = arith.constant 0 : index
    %145 = vector.load %arg7[%c0_56, %c0_57] : memref<1x128xf32, #tpu.memory_space<vmem>>, vector<1x128xf32>
    %146 = vector.broadcast %145 : vector<1x128xf32> to vector<8x128xf32>
    %147 = arith.addf %144, %146 : vector<8x128xf32>
    %c0_58 = arith.constant 0 : index
    %c0_59 = arith.constant 0 : index
    %148 = vector.load %arg8[%c0_58, %c0_59] : memref<8x128xf32, #tpu.memory_space<vmem>>, vector<8x128xf32>
    tpu.vector_store %arg8[%c0_58, %c0_59], %147 {strides = array<i32>} : memref<8x128xf32, #tpu.memory_space<vmem>>, vector<8x128xf32>,
    return
  }
  func.func @transform_0(%arg0: i32) -> (i32, i32) {
    %c0_i32 = arith.constant 0 : i32
    %c0_i32_0 = arith.constant 0 : i32
    return %arg0, %c0_i32 : i32, i32
  }
  func.func @transform_1(%arg0: i32) -> (i32, i32) {
    %c0_i32 = arith.constant 0 : i32
    %c0_i32_0 = arith.constant 0 : i32
    %c0_i32_1 = arith.constant 0 : i32
    return %c0_i32, %c0_i32_0 : i32, i32
  }
  func.func @transform_2(%arg0: i32) -> (i32, i32) {
    %c0_i32 = arith.constant 0 : i32
    %c0_i32_0 = arith.constant 0 : i32
    %c0_i32_1 = arith.constant 0 : i32
    return %c0_i32, %c0_i32_0 : i32, i32
  }
  func.func @transform_3(%arg0: i32) -> (i32, i32, i32) {
    %c0_i32 = arith.constant 0 : i32
    %c0_i32_0 = arith.constant 0 : i32
    %c0_i32_1 = arith.constant 0 : i32
    %c0_i32_2 = arith.constant 0 : i32
    return %c0_i32, %c0_i32_0, %c0_i32_1 : i32, i32, i32
  }
  func.func @transform_4(%arg0: i32) -> (i32, i32) {
    %c0_i32 = arith.constant 0 : i32
    %c0_i32_0 = arith.constant 0 : i32
    %c0_i32_1 = arith.constant 0 : i32
    return %c0_i32, %c0_i32_0 : i32, i32
  }
  func.func @transform_5(%arg0: i32) -> (i32, i32) {
    %c0_i32 = arith.constant 0 : i32
    %c0_i32_0 = arith.constant 0 : i32
    %c0_i32_1 = arith.constant 0 : i32
    return %c0_i32, %c0_i32_0 : i32, i32
  }
  func.func @transform_6(%arg0: i32) -> (i32, i32) {
    %c0_i32 = arith.constant 0 : i32
    %c0_i32_0 = arith.constant 0 : i32
    %c0_i32_1 = arith.constant 0 : i32
    return %c0_i32, %c0_i32_0 : i32, i32
  }
  func.func @transform_7(%arg0: i32) -> (i32, i32) {
    %c0_i32 = arith.constant 0 : i32
    %c0_i32_0 = arith.constant 0 : i32
    return %arg0, %c0_i32 : i32, i32
  }
}

</mosaic_0001>

<bundles_post_ra>
// kernel: tpu_custom_call.1
= control target key start
LH: loop header
LB: loop body
LE: loop exit
PB: predicated region body
PF: predicated region fallthrough
CT: control target
= control target key end

     0   :  { %12 = vsyncpa [#allocation3], 0  ;;  %s1525_s0 = inlined_call_operand.hbm [shape: f32[8,16], index: 0, kind: input, shape index: {}]   ;;  %s1526_s1 = inlined_call_operand.hbm [shape: bf16[16,32], index: 1, kind: input, shape index: {}]   ;;  %s1527_s2 = inlined_call_operand.vmem [shape: f32[1,32], index: 2, kind: input, shape index: {}]   ;;  %s1528_s3 = inlined_call_operand.hbm [shape: bf16[11,32,32], index: 3, kind: input, shape index: {}]   ;;  %s1529_s4 = inlined_call_operand.hbm [shape: f32[11,32], index: 4, kind: input, shape index: {}]   ;;  %s1530_s5 = inlined_call_operand.vmem [shape: bf16[32,128], index: 5, kind: input, shape index: {}]   ;;  %s1531_s6 = inlined_call_operand.vmem [shape: f32[1,128], index: 6, kind: input, shape index: {}]   ;;  %s1532_s7 = inlined_call_operand.hbm [shape: f32[8,128], index: 7, kind: output, shape index: {}]  }
   0x1   :  { %13 = vsyncpa [#allocation6], 0 }
   0x2   :  { %14 = vsyncpa [#allocation9], 0 }
   0x3   :  { %15 = vsyncpa [#allocation4], 0  ;;  %s1301_s24 = smov [#allocation5]   ;;  %s1183_s28 = scalar_lea.hbm %s1526_s1, 128 }
   0x4   :  { %s31_s25 = sshll.u32 %s1301_s24, 4  ;;  %p1184_p0 = scmp.ne.s32.totalorder %s1526_s1, %s1183_s28  ;;  %s32_s25 = int_to_ptr.vmem [resolvable:$true] %s31_s25 }
   0x5   :  { %p1187_p1 = scmp.lt.u32.totalorder %s1183_s28, %s1526_s1 }
   0x7   :  { %p1189_p2 = pnand %p1187_p1, %p1184_p0 }
   0x9   :  { %1192 = shalt.err (!%p1189_p2)
}
   0xa   :  { %s1193_s10 = scalar_lea.vmem %s32_s25, 128  ;;  %p1198_p4 = scmp.lt.s32.totalorder %s32_s25, %s32_s25 }
   0xb   :  { %p1194_p3 = scmp.ne.s32.totalorder %s32_s25, %s1193_s10  ;;  %p1199_p5 = scmp.lt.s32.totalorder %s1193_s10, %s1193_s10 }
   0xd   :  { %p1200_p6 = por %p1199_p5, %p1198_p4 }
   0xf   :  { %p1201_p7 = pnand %p1200_p6, %p1194_p3 }
  0x11   :  { %1204 = shalt.err (!%p1201_p7)
}
  0x12   :  { %s1302_s11 = smov 64   ;;  %s1303_s12 = smov 4  }
  0x13   :  { %37 = dma.hbm_to_vmem [thread:$0]  %s1526_s1, 128, %s32_s25, [#allocation6], %s1302_s11, %s1302_s11, %s1303_s12  }
  0x14   :  { %s1304_s15 = smov [#allocation2]   ;;  %s1305_s17 = smov [#allocation7]  }
  0x15   :  { %s22_s16 = sshll.u32 %s1304_s15, 4  ;;  %s45_s18 = sshll.u32 %s1305_s17, 4  ;;  %s23_s16 = int_to_ptr.vmem [resolvable:$true] %s22_s16  ;;  %s46_s18 = int_to_ptr.vmem [resolvable:$true] %s45_s18 }
  0x16   :  { %s1205_s21 = scalar_lea.hbm %s1525_s0, 128 }
  0x17   :  { %p1206_p8 = scmp.ne.s32.totalorder %s1525_s0, %s1205_s21  ;;  %p1209_p9 = scmp.lt.u32.totalorder %s1205_s21, %s1525_s0 }
  0x19   :  { %p1211_p10 = pnand %p1209_p9, %p1206_p8 }
  0x1b   :  { %1214 = shalt.err (!%p1211_p10)
}
  0x1c   :  { %s1215_s1 = scalar_lea.vmem %s23_s16, 128  ;;  %p1220_p12 = scmp.lt.s32.totalorder %s23_s16, %s23_s16 }
  0x1d   :  { %p1216_p11 = scmp.ne.s32.totalorder %s23_s16, %s1215_s1  ;;  %p1221_p13 = scmp.lt.s32.totalorder %s1215_s1, %s1215_s1 }
  0x1f   :  { %p1222_p0 = por %p1221_p13, %p1220_p12 }
  0x21   :  { %p1223_p1 = pnand %p1222_p0, %p1216_p11 }
  0x23   :  { %1226 = shalt.err (!%p1223_p1)
}
  0x24   :  { %25 = dma.hbm_to_vmem [thread:$0]  %s1525_s0, 128, %s23_s16, [#allocation3]  }
  0x25   :  { %s1227_s30 = scalar_lea.hbm %s1528_s3, 2816 }
  0x26   :  { %p1228_p2 = scmp.ne.s32.totalorder %s1528_s3, %s1227_s30  ;;  %p1231_p3 = scmp.lt.u32.totalorder %s1227_s30, %s1528_s3 }
  0x28   :  { %p1233_p4 = pnand %p1231_p3, %p1228_p2 }
  0x2a   :  { %1236 = shalt.err (!%p1233_p4)
}
  0x2b   :  { %s1237_s14 = scalar_lea.vmem %s46_s18, 2816  ;;  %p1242_p6 = scmp.lt.s32.totalorder %s46_s18, %s46_s18 }
  0x2c   :  { %p1238_p5 = scmp.ne.s32.totalorder %s46_s18, %s1237_s14  ;;  %p1243_p7 = scmp.lt.s32.totalorder %s1237_s14, %s1237_s14 }
  0x2e   :  { %p1244_p8 = por %p1243_p7, %p1242_p6 }
  0x30   :  { %p1245_p9 = pnand %p1244_p8, %p1238_p5 }
  0x32   :  { %1248 = shalt.err (!%p1245_p9)
}
  0x33   :  { %51 = dma.hbm_to_vmem [thread:$0]  %s1528_s3, 2816, %s46_s18, [#allocation6], %s1302_s11, %s1302_s11, %s1303_s12  }
  0x34   :  { %s1306_s16 = smov [#allocation8]   ;;  %s1249_s21 = scalar_lea.hbm %s1529_s4, 256 }
  0x35   :  { %s57_s17 = sshll.u32 %s1306_s16, 4  ;;  %p1250_p10 = scmp.ne.s32.totalorder %s1529_s4, %s1249_s21  ;;  %s58_s17 = int_to_ptr.vmem [resolvable:$true] %s57_s17 }
  0x36   :  { %p1253_p11 = scmp.lt.u32.totalorder %s1249_s21, %s1529_s4 }
  0x38   :  { %p1255_p12 = pnand %p1253_p11, %p1250_p10 }
  0x3a   :  { %1258 = shalt.err (!%p1255_p12)
}
  0x3b   :  { %s1259_s1 = scalar_lea.vmem %s58_s17, 256  ;;  %p1264_p0 = scmp.lt.s32.totalorder %s58_s17, %s58_s17 }
  0x3c   :  { %p1260_p13 = scmp.ne.s32.totalorder %s58_s17, %s1259_s1  ;;  %p1265_p1 = scmp.lt.s32.totalorder %s1259_s1, %s1259_s1 }
  0x3e   :  { %p1266_p2 = por %p1265_p1, %p1264_p0 }
  0x40   :  { %p1267_p3 = pnand %p1266_p2, %p1260_p13 }
  0x42   :  { %1270 = shalt.err (!%p1267_p3)
}
  0x43   :  { %s1307_s3 = smov 128   ;;  %s1308_s11 = smov 8  }
  0x44   :  { %63 = dma.hbm_to_vmem [thread:$0]  %s1529_s4, 256, %s58_s17, [#allocation9], %s1307_s3, %s1307_s3, %s1308_s11  }
  0x45   :  { %1293 = dma.done.wait [#allocation3], 128  }
  0x46   :  { %1294 = vsyncadd [#allocation3], 4294967168 }
  0x47   :  { %1295 = dma.done.wait [#allocation6], 2944  }
  0x48   :  { %1296 = vsyncadd [#allocation6], 4294964352 }
  0x49   :  { %1297 = dma.done.wait [#allocation9], 256  }
  0x4a   :  { %1298 = vsyncadd [#allocation9], 4294967040  ;;  %v1309_v0 = vmov 0.0   ;;  %vm1310_vm0 = vmmov 0   ;;  %v1158_v1 = vld [vmem:[#allocation5] sm:$0xff]   ;;  %v81_v2 = vld [vmem:[#allocation2] sm:$0xff]  ;;  %v150_v16 = vlaneseq }
  0x4b   :  { %1045 = vmatprep.subr.bf16.mxu0 %v1309_v0  ;;  %1047 = vmatprep.mubr.msk.bf16.mxu0 %vm1310_vm0, %v1309_v0  ;;  %vm98_vm1 = vcmask 130048   ;;  %v82_v3 = vpack.c.bf16 %v81_v2, %v81_v2  ;;  %v1159_v4 = vld [vmem:[#allocation7] sm:$0xff]   ;;  %v1160_v5 = vld [vmem:[#allocation7 + $0x8] sm:$0xff]   ;;  %vm166_vm2 = vcmask 261120   ;;  %v1161_v14 = vld [vmem:[#allocation7 + $0x10] sm:$0xff]   ;;  %s1311_s9 = smov [#allocation10]  }
  0x4c   :  { %1051 = vmatprep.subr.bf16.mxu1 %v1309_v0  ;;  %1055 = vmatprep.mubr.msk.bf16.mxu1 %vm1310_vm0, %v1309_v0  ;;  %v967_v6 = vld [vmem:[%s1527_s2] ss:$0 sm:$0xff]  ;;  %v1162_v15 = vld [vmem:[#allocation7 + $0x18] sm:$0xff]   ;;  %v1425_v17 = vshrl.u32 %v150_v16, 7  ;;  %v1428_v19 = vld [vmem:[#allocation8] sm:$0xff] }
  0x4d   :  { %1046 = vmatpush3.bf16.msra.mxu0 %v1158_v1  ;;  %1052 = vmatpush3.bf16.msra.mxu1 %v1159_v4  ;;  %v1163_v29 = vld [vmem:[#allocation7 + $0x20] sm:$0xff]   ;;  %v1164_v30 = vld [vmem:[#allocation7 + $0x28] sm:$0xff]   ;;  %v1165_v41 = vld [vmem:[#allocation7 + $0x30] sm:$0xff]  }
  0x4e   :  { %1059 = vmatprep.subr.bf16.mxu0 %v1309_v0  ;;  %1053 = vmatprep.subr.bf16.mxu1 %v1309_v0  ;;  %v152_v18 = vsub.s32 0, %v1425_v17  ;;  %v220_v31 = vsub.s32 1, %v1425_v17  ;;  %v1166_v42 = vld [vmem:[#allocation7 + $0x38] sm:$0xff]   ;;  %v287_v43 = vsub.s32 2, %v1425_v17  ;;  %v1167_v53 = vld [vmem:[#allocation7 + $0x40] sm:$0xff]   ;;  %v1168_v54 = vld [vmem:[#allocation7 + $0x48] sm:$0xff]  }
  0x4f   :  { %v354_v55 = vsub.s32 3, %v1425_v17  ;;  %v1169_v2 = vld [vmem:[#allocation7 + $0x50] sm:$0xff]   ;;  %v421_v4 = vsub.s32 4, %v1425_v17  ;;  %v488_v16 = vsub.s32 5, %v1425_v17 }
  0x50   :  { %1048 = vmatmul.mubr.msk.bf16.vlgmr.msra.gmra.mrb[0].mxu0 %vm98_vm1, %v82_v3  ;;  %v153_v20 = vrot.slane %v1428_v19, %v152_v18  ;;  %v221_v32 = vrot.slane %v1428_v19, %v220_v31  ;;  %v288_v44 = vrot.slane %v1428_v19, %v287_v43  ;;  %v1170_v3 = vld [vmem:[#allocation7 + $0x58] sm:$0xff]  }
  0x51   :  { %1063 = vmatprep.mubr.msk.bf16.mxu0 %vm1310_vm0, %v1309_v0  ;;  %1054 = vmatpush3.bf16.msra.mxu1 %v1160_v5  ;;  %v355_v56 = vrot.slane %v1428_v19, %v354_v55  ;;  %v422_v5 = vrot.slane %v1428_v19, %v421_v4  ;;  %v1177_v55 = vld [vmem:[#allocation7 + $0x90] sm:$0xff]   ;;  %v1180_v4 = vld [vmem:[#allocation7 + $0xa8] sm:$0xff]  }
  0x52   :  { %1067 = vmatprep.subr.bf16.mxu1 %v1309_v0  ;;  %1060 = vmatpush3.bf16.msra.mxu0 %v1161_v14  ;;  %v1171_v14 = vld [vmem:[#allocation7 + $0x60] sm:$0xff]  }
  0x53   :  { %1061 = vmatprep.subr.bf16.mxu0 %v1309_v0 }
  0x56   :  { %1062 = vmatpush3.bf16.msra.mxu0 %v1162_v15  ;;  %v1172_v15 = vld [vmem:[#allocation7 + $0x68] sm:$0xff]  }
  0x57   :  { %1075 = vmatprep.subr.bf16.mxu0 %v1309_v0 }
 0x123   :  { %v136_v7 = vpop.f32.mrb[0].mxu0 }
 0x124   :  { %v137_v8 = vadd.f32 %v967_v6, %v136_v7  ;;  %v1049_v9 = vpop.f32.mrb[1].mxu0 }
 0x125   :  { %v139_v10 = vpop.f32.mrb[2].mxu0 }
 0x126   :  { %v142_v11 = vmax.f32 %v137_v8, 0.0  ;;  %v1050_v12 = vpop.f32.mrb[3].mxu0 }
 0x128   :  { %v145_v13 = vpack.c.bf16 %v142_v11, %v142_v11 }
 0x12a   :  { %1056 = vmatmul.mubr.msk.bf16.vlgmr.msra.gmra.mrb[0].mxu1 %vm166_vm2, %v145_v13 }
 0x12b   :  { %1071 = vmatprep.mubr.msk.bf16.mxu1 %vm1310_vm0, %v1309_v0  ;;  %1068 = vmatpush3.bf16.msra.mxu1 %v1163_v29  ;;  %v1173_v29 = vld [vmem:[#allocation7 + $0x70] sm:$0xff]  }
 0x12c   :  { %1069 = vmatprep.subr.bf16.mxu1 %v1309_v0 }
 0x12f   :  { %1070 = vmatpush3.bf16.msra.mxu1 %v1164_v30  ;;  %v1174_v30 = vld [vmem:[#allocation7 + $0x78] sm:$0xff]  }
 0x130   :  { %1083 = vmatprep.subr.bf16.mxu1 %v1309_v0 }
 0x1fd   :  { %v204_v21 = vpop.f32.mrb[0].mxu1 }
 0x1fe   :  { %v205_v22 = vadd.f32 %v204_v21, %v153_v20  ;;  %v1057_v23 = vpop.f32.mrb[1].mxu1  ;;  %v489_v20 = vrot.slane %v1428_v19, %v488_v16 }
 0x1ff   :  { %v207_v24 = vpop.f32.mrb[2].mxu1 }
 0x200   :  { %v210_v25 = vmax.f32 %v205_v22, 0.0  ;;  %v1058_v26 = vpop.f32.mrb[3].mxu1 }
 0x202   :  { %v211_v27 = vadd.f32 %v210_v25, %v142_v11 }
 0x204   :  { %v212_v28 = vpack.c.bf16 %v211_v27, %v211_v27 }
 0x206   :  { %1064 = vmatmul.mubr.msk.bf16.vlgmr.msra.gmra.mrb[4].mxu0 %vm166_vm2, %v212_v28 }
 0x207   :  { %1079 = vmatprep.mubr.msk.bf16.mxu0 %vm1310_vm0, %v1309_v0  ;;  %1076 = vmatpush3.bf16.msra.mxu0 %v1165_v41 }
 0x208   :  { %1077 = vmatprep.subr.bf16.mxu0 %v1309_v0 }
 0x20b   :  { %1078 = vmatpush3.bf16.msra.mxu0 %v1166_v42  ;;  %v1175_v42 = vld [vmem:[#allocation7 + $0x80] sm:$0xff]  }
 0x20c   :  { %1091 = vmatprep.subr.bf16.mxu0 %v1309_v0 }
 0x2d9   :  { %v271_v33 = vpop.f32.mrb[4].mxu0 }
 0x2da   :  { %v272_v34 = vadd.f32 %v271_v33, %v221_v32  ;;  %v1065_v35 = vpop.f32.mrb[5].mxu0  ;;  %v555_v32 = vsub.s32 6, %v1425_v17 }
 0x2db   :  { %v274_v36 = vpop.f32.mrb[6].mxu0 }
 0x2dc   :  { %v277_v37 = vmax.f32 %v272_v34, 0.0  ;;  %v1066_v38 = vpop.f32.mrb[7].mxu0  ;;  %v556_v33 = vrot.slane %v1428_v19, %v555_v32 }
 0x2de   :  { %v278_v39 = vadd.f32 %v277_v37, %v211_v27 }
 0x2e0   :  { %v279_v40 = vpack.c.bf16 %v278_v39, %v278_v39 }
 0x2e2   :  { %1072 = vmatmul.mubr.msk.bf16.vlgmr.msra.gmra.mrb[4].mxu1 %vm166_vm2, %v279_v40 }
 0x2e3   :  { %1087 = vmatprep.mubr.msk.bf16.mxu1 %vm1310_vm0, %v1309_v0  ;;  %1084 = vmatpush3.bf16.msra.mxu1 %v1167_v53 }
 0x2e4   :  { %1085 = vmatprep.subr.bf16.mxu1 %v1309_v0 }
 0x2e7   :  { %1086 = vmatpush3.bf16.msra.mxu1 %v1168_v54 }
 0x2e8   :  { %1099 = vmatprep.subr.bf16.mxu1 %v1309_v0 }
 0x3b5   :  { %v338_v45 = vpop.f32.mrb[4].mxu1 }
 0x3b6   :  { %v339_v46 = vadd.f32 %v338_v45, %v288_v44  ;;  %v1073_v47 = vpop.f32.mrb[5].mxu1  ;;  %v1176_v44 = vld [vmem:[#allocation7 + $0x88] sm:$0xff]   ;;  %v622_v45 = vsub.s32 7, %v1425_v17 }
 0x3b7   :  { %v341_v48 = vpop.f32.mrb[6].mxu1 }
 0x3b8   :  { %v344_v49 = vmax.f32 %v339_v46, 0.0  ;;  %v1074_v50 = vpop.f32.mrb[7].mxu1  ;;  %v623_v46 = vrot.slane %v1428_v19, %v622_v45  ;;  %v144_v19 = vld [vmem:[#allocation8 + $0x8] sm:$0x7] }
 0x3ba   :  { %v345_v51 = vadd.f32 %v344_v49, %v278_v39 }
 0x3bc   :  { %v346_v52 = vpack.c.bf16 %v345_v51, %v345_v51 }
 0x3be   :  { %1080 = vmatmul.mubr.msk.bf16.vlgmr.msra.gmra.mrb[8].mxu0 %vm166_vm2, %v346_v52 }
 0x3bf   :  { %1095 = vmatprep.mubr.msk.bf16.mxu0 %vm1310_vm0, %v1309_v0  ;;  %1092 = vmatpush3.bf16.msra.mxu0 %v1169_v2 }
 0x3c0   :  { %1093 = vmatprep.subr.bf16.mxu0 %v1309_v0 }
 0x3c3   :  { %1094 = vmatpush3.bf16.msra.mxu0 %v1170_v3  ;;  %v1179_v3 = vld [vmem:[#allocation7 + $0xa0] sm:$0xff]  }
 0x3c4   :  { %1107 = vmatprep.subr.bf16.mxu0 %v1309_v0 }
 0x491   :  { %v405_v57 = vpop.f32.mrb[8].mxu0 }
 0x492   :  { %v406_v58 = vadd.f32 %v405_v57, %v355_v56  ;;  %v1081_v59 = vpop.f32.mrb[9].mxu0  ;;  %v1178_v56 = vld [vmem:[#allocation7 + $0x98] sm:$0xff]   ;;  %v690_v57 = vrot.slane %v144_v19, %v152_v18  ;;  %v757_v18 = vrot.slane %v144_v19, %v220_v31  ;;  %v1182_v31 = vld [vmem:[%s1530_s5 + $0x8] sm:$0xff]  }
 0x493   :  { %v408_v60 = vpop.f32.mrb[10].mxu0 }
 0x494   :  { %v411_v61 = vmax.f32 %v406_v58, 0.0  ;;  %v1082_v62 = vpop.f32.mrb[11].mxu0 }
 0x496   :  { %v412_v63 = vadd.f32 %v411_v61, %v345_v51 }
 0x498   :  { %v413_v1 = vpack.c.bf16 %v412_v63, %v412_v63 }
 0x49a   :  { %1088 = vmatmul.mubr.msk.bf16.vlgmr.msra.gmra.mrb[8].mxu1 %vm166_vm2, %v413_v1 }
 0x49b   :  { %1103 = vmatprep.mubr.msk.bf16.mxu1 %vm1310_vm0, %v1309_v0  ;;  %1100 = vmatpush3.bf16.msra.mxu1 %v1171_v14  ;;  %v824_v14 = vrot.slane %v144_v19, %v287_v43 }
 0x49c   :  { %1101 = vmatprep.subr.bf16.mxu1 %v1309_v0 }
 0x49f   :  { %1102 = vmatpush3.bf16.msra.mxu1 %v1172_v15 }
 0x4a0   :  { %1115 = vmatprep.subr.bf16.mxu1 %v1309_v0 }
 0x56d   :  { %v472_v6 = vpop.f32.mrb[8].mxu1 }
 0x56e   :  { %v473_v7 = vadd.f32 %v472_v6, %v422_v5  ;;  %v1089_v8 = vpop.f32.mrb[9].mxu1 }
 0x56f   :  { %v475_v9 = vpop.f32.mrb[10].mxu1 }
 0x570   :  { %v478_v10 = vmax.f32 %v473_v7, 0.0  ;;  %v1090_v11 = vpop.f32.mrb[11].mxu1 }
 0x572   :  { %v479_v12 = vadd.f32 %v478_v10, %v412_v63 }
 0x574   :  { %v480_v13 = vpack.c.bf16 %v479_v12, %v479_v12 }
 0x576   :  { %1096 = vmatmul.mubr.msk.bf16.vlgmr.msra.gmra.mrb[12].mxu0 %vm166_vm2, %v480_v13  ;;  %v1181_v13 = vld [vmem:[%s1530_s5] sm:$0xff]   ;;  %s956_s5 = sshll.u32 %s1311_s9, 4  ;;  %s957_s5 = int_to_ptr.vmem [resolvable:$true] %s956_s5 }
 0x577   :  { %1111 = vmatprep.mubr.msk.bf16.mxu0 %vm1310_vm0, %v1309_v0  ;;  %1108 = vmatpush3.bf16.msra.mxu0 %v1173_v29  ;;  %s1271_s10 = scalar_lea.vmem %s957_s5, 128  ;;  %p1276_p5 = scmp.lt.s32.totalorder %s957_s5, %s957_s5 }
 0x578   :  { %1109 = vmatprep.subr.bf16.mxu0 %v1309_v0  ;;  %p1272_p4 = scmp.ne.s32.totalorder %s957_s5, %s1271_s10  ;;  %p1277_p6 = scmp.lt.s32.totalorder %s1271_s10, %s1271_s10 }
 0x57a   :  { %p1278_p7 = por %p1277_p6, %p1276_p5 }
 0x57b   :  { %1110 = vmatpush3.bf16.msra.mxu0 %v1174_v30 }
 0x57c   :  { %1123 = vmatprep.subr.bf16.mxu0 %v1309_v0  ;;  %p1279_p8 = pnand %p1278_p7, %p1272_p4 }
 0x649   :  { %v539_v21 = vpop.f32.mrb[12].mxu0 }
 0x64a   :  { %v540_v22 = vadd.f32 %v539_v21, %v489_v20  ;;  %v1097_v23 = vpop.f32.mrb[13].mxu0 }
 0x64b   :  { %v542_v24 = vpop.f32.mrb[14].mxu0 }
 0x64c   :  { %v545_v25 = vmax.f32 %v540_v22, 0.0  ;;  %v1098_v26 = vpop.f32.mrb[15].mxu0 }
 0x64e   :  { %v546_v27 = vadd.f32 %v545_v25, %v479_v12 }
 0x650   :  { %v547_v28 = vpack.c.bf16 %v546_v27, %v546_v27 }
 0x652   :  { %1104 = vmatmul.mubr.msk.bf16.vlgmr.msra.gmra.mrb[12].mxu1 %vm166_vm2, %v547_v28 }
 0x653   :  { %1119 = vmatprep.mubr.msk.bf16.mxu1 %vm1310_vm0, %v1309_v0  ;;  %1116 = vmatpush3.bf16.msra.mxu1 %v1175_v42 }
 0x654   :  { %1117 = vmatprep.subr.bf16.mxu1 %v1309_v0 }
 0x657   :  { %1118 = vmatpush3.bf16.msra.mxu1 %v1176_v44 }
 0x658   :  { %1131 = vmatprep.subr.bf16.mxu1 %v1309_v0 }
 0x725   :  { %v606_v34 = vpop.f32.mrb[12].mxu1 }
 0x726   :  { %v607_v35 = vadd.f32 %v606_v34, %v556_v33  ;;  %v1105_v36 = vpop.f32.mrb[13].mxu1 }
 0x727   :  { %v609_v37 = vpop.f32.mrb[14].mxu1 }
 0x728   :  { %v612_v38 = vmax.f32 %v607_v35, 0.0  ;;  %v1106_v39 = vpop.f32.mrb[15].mxu1 }
 0x72a   :  { %v613_v40 = vadd.f32 %v612_v38, %v546_v27 }
 0x72c   :  { %v614_v41 = vpack.c.bf16 %v613_v40, %v613_v40 }
 0x72e   :  { %1112 = vmatmul.mubr.msk.bf16.vlgmr.msra.gmra.mrb[16].mxu0 %vm166_vm2, %v614_v41 }
 0x72f   :  { %1127 = vmatprep.mubr.msk.bf16.mxu0 %vm1310_vm0, %v1309_v0  ;;  %1124 = vmatpush3.bf16.msra.mxu0 %v1177_v55 }
 0x730   :  { %1125 = vmatprep.subr.bf16.mxu0 %v1309_v0 }
 0x733   :  { %1126 = vmatpush3.bf16.msra.mxu0 %v1178_v56 }
 0x734   :  { %1139 = vmatprep.subr.bf16.mxu0 %v1309_v0 }
 0x801   :  { %v673_v47 = vpop.f32.mrb[16].mxu0 }
 0x802   :  { %v674_v48 = vadd.f32 %v673_v47, %v623_v46  ;;  %v1113_v49 = vpop.f32.mrb[17].mxu0 }
 0x803   :  { %v676_v50 = vpop.f32.mrb[18].mxu0 }
 0x804   :  { %v679_v51 = vmax.f32 %v674_v48, 0.0  ;;  %v1114_v52 = vpop.f32.mrb[19].mxu0 }
 0x806   :  { %v680_v53 = vadd.f32 %v679_v51, %v613_v40 }
 0x808   :  { %v681_v54 = vpack.c.bf16 %v680_v53, %v680_v53 }
 0x80a   :  { %1120 = vmatmul.mubr.msk.bf16.vlgmr.msra.gmra.mrb[16].mxu1 %vm166_vm2, %v681_v54 }
 0x80b   :  { %1135 = vmatprep.mubr.msk.bf16.mxu1 %vm1310_vm0, %v1309_v0  ;;  %1132 = vmatpush3.bf16.msra.mxu1 %v1179_v3 }
 0x80c   :  { %1133 = vmatprep.subr.bf16.mxu1 %v1309_v0 }
 0x80f   :  { %1134 = vmatpush3.bf16.msra.mxu1 %v1180_v4 }
 0x8dd   :  { %v740_v58 = vpop.f32.mrb[16].mxu1 }
 0x8de   :  { %v741_v59 = vadd.f32 %v740_v58, %v690_v57  ;;  %v1121_v60 = vpop.f32.mrb[17].mxu1 }
 0x8df   :  { %v743_v61 = vpop.f32.mrb[18].mxu1 }
 0x8e0   :  { %v746_v62 = vmax.f32 %v741_v59, 0.0  ;;  %v1122_v63 = vpop.f32.mrb[19].mxu1 }
 0x8e2   :  { %v747_v1 = vadd.f32 %v746_v62, %v680_v53 }
 0x8e4   :  { %v748_v2 = vpack.c.bf16 %v747_v1, %v747_v1 }
 0x8e6   :  { %1128 = vmatmul.mubr.msk.bf16.vlgmr.msra.gmra.mrb[20].mxu0 %vm166_vm2, %v748_v2 }
 0x8e7   :  { %1143 = vmatprep.mubr.msk.bf16.mxu0 %vm1310_vm0, %v1309_v0  ;;  %1140 = vmatpush3.bf16.msra.mxu0 %v1181_v13 }
 0x8e8   :  { %1141 = vmatprep.subr.bf16.mxu0 %v1309_v0  ;;  %v1003_v0 = vld [vmem:[%s1531_s6] ss:$0 sm:$0xff] }
 0x8eb   :  { %1142 = vmatpush3.bf16.msra.mxu0 %v1182_v31 }
 0x9b9   :  { %v807_v5 = vpop.f32.mrb[20].mxu0 }
 0x9ba   :  { %v808_v6 = vadd.f32 %v807_v5, %v757_v18  ;;  %v1129_v7 = vpop.f32.mrb[21].mxu0 }
 0x9bb   :  { %v810_v8 = vpop.f32.mrb[22].mxu0 }
 0x9bc   :  { %v813_v9 = vmax.f32 %v808_v6, 0.0  ;;  %v1130_v10 = vpop.f32.mrb[23].mxu0 }
 0x9be   :  { %v814_v11 = vadd.f32 %v813_v9, %v747_v1 }
 0x9c0   :  { %v815_v12 = vpack.c.bf16 %v814_v11, %v814_v11 }
 0x9c2   :  { %1136 = vmatmul.mubr.msk.bf16.vlgmr.msra.gmra.mrb[20].mxu1 %vm166_vm2, %v815_v12 }
 0xa95   :  { %v874_v15 = vpop.f32.mrb[20].mxu1 }
 0xa96   :  { %v875_v16 = vadd.f32 %v874_v15, %v824_v14  ;;  %v1137_v20 = vpop.f32.mrb[21].mxu1 }
 0xa97   :  { %v877_v21 = vpop.f32.mrb[22].mxu1 }
 0xa98   :  { %v880_v22 = vmax.f32 %v875_v16, 0.0  ;;  %v1138_v23 = vpop.f32.mrb[23].mxu1 }
 0xa9a   :  { %v881_v24 = vadd.f32 %v880_v22, %v814_v11 }
 0xa9c   :  { %v882_v25 = vpack.c.bf16 %v881_v24, %v881_v24 }
 0xa9e   :  { %1144 = vmatmul.mubr.msk.bf16.vlgmr.msra.gmra.mrb[24].mxu0 %vm166_vm2, %v882_v25 }
 0xb71   :  { %v943_v26 = vpop.f32.mrb[24].mxu0 }
 0xb72   :  { %v944_v27 = vadd.f32 %v1003_v0, %v943_v26  ;;  %v1145_v17 = vpop.f32.mrb[25].mxu0 }
 0xb73   :  { %v946_v43 = vpop.f32.mrb[26].mxu0 }
 0xb74   :  { %949 = vst [vmem:[#allocation10] sm:$0xff] %v944_v27  ;;  %v1146_v28 = vpop.f32.mrb[27].mxu0 }
 0xb75   :  { %1282 = shalt.err (!%p1279_p8)
}
 0xb76   :  { %s1283_s6 = scalar_lea.hbm %s1532_s7, 128 }
 0xb77   :  { %p1284_p9 = scmp.ne.s32.totalorder %s1532_s7, %s1283_s6  ;;  %p1287_p10 = scmp.lt.u32.totalorder %s1283_s6, %s1532_s7 }
 0xb79   :  { %p1289_p11 = pnand %p1287_p10, %p1284_p9 }
 0xb7b   :  { %1292 = shalt.err (!%p1289_p11)
}
 0xb7c   :  { %959 = dma.vmem_to_hbm [thread:$0]  %s957_s5, 128, %s1532_s7, [#allocation4]  }
 0xb7d   :  { %1299 = dma.done.wait [#allocation4], 128  }
 0xb7e   :  { %1300 = vsyncadd [#allocation4], 4294967168 }
 0xb7f   :  { %963 = vsyncpa [#allocation3], 1 }
 0xb80   :  { %964 = vsyncpa [#allocation6], 1 }
 0xb81   :  { %965 = vsyncpa [#allocation9], 1 }
 0xb82   :  { %966 = vsyncpa [#allocation4], 1 }

</bundles_post_ra>
